<compile_context>
chip_gen: v5e
topology: v5e:2x2
jax: 0.10.0
libtpu: 0.0.40
codegen_flags: <defaults>
</compile_context>

<pallas_src>
import functools

import jax
import jax.numpy as jnp
import numpy as np
from jax.experimental import pallas as pl
from jax.experimental.pallas import tpu as pltpu

T_KD = 2.0    # distillation temperature (kd_kl_loss default T=2)
_EPS = 1e-9   # matches torch.log(weight + 1e-09)


# --------------------------- generation-aware tiling ---------------------------

def _tpu_profile():
    kind = ""
    try:
        dev = jax.devices()[0]
        if dev.platform == "tpu":
            kind = dev.device_kind.lower()
    except Exception:
        pass
    if "v7" in kind:
        # 64 MiB VMEM per TensorCore, 2 TCs/chip -> shard the grid across both cores.
        return {"tile_budget": 36 << 20, "vmem_limit": 48 << 20, "cores": 2}
    if "v6" in kind:
        # 128 MiB physical VMEM: feed much bigger tiles than the v5e-safe default.
        return {"tile_budget": 56 << 20, "vmem_limit": 100 << 20, "cores": 1}
    # v5e / unknown: stay within the 16 MiB default scoped-VMEM limit.
    return {"tile_budget": 12 << 20, "vmem_limit": None, "cores": 1}


def _choose_tile_rows(n_rows, n_cols, itemsize, budget_bytes):
    """Largest row tile whose working set (2 double-buffered inputs plus ~9 live
    f32 whole-tile temporaries inside the body) stays under budget_bytes."""
    align = max(8, 32 // max(itemsize, 1))          # f32: 8, bf16: 16
    per_row = n_cols * (4 * itemsize + 36)
    cap = int(min(max(align, budget_bytes // max(per_row, 1)), 4096))
    if n_rows <= cap:
        return n_rows                               # single tile == full array dim
    return max(align, (cap // align) * align)


# ----------------------------------- kernel -----------------------------------

def _kl_sums_kernel(s_ref, t_ref, *rest, n_rows, tile_rows, tiles_per_slot,
                    inv_t, compute_balanced, teacher_biased, shared_max,
                    approx_recip):
    """Accumulates per-row KL partial sums into the (tile_rows, n_terms) output block
       owned by this parallel slot:
         col 0: KL(softmax(t/T) || softmax(s/T))
         col 1: same with the class-frequency bias applied (if requested)
       The 1/(N*C) mean and the sigmoid(W) mixing are applied by the wrapper."""
    if compute_balanced:
        b_ref, out_ref = rest
    else:
        (out_ref,) = rest

    p = pl.program_id(0)      # parallel slot (TensorCore on v7x)
    i = pl.program_id(1)      # row tile within the slot

    @pl.when(i == 0)
    def _init():
        out_ref[...] = jnp.zeros_like(out_ref)

    # Upcast inside the kernel so bf16 inputs stay bf16 in HBM (half the DMA bytes).
    ss = s_ref[...].astype(jnp.float32) * inv_t            # student logits / T
    ts = t_ref[...].astype(jnp.float32) * inv_t             # teacher logits / T

    # Row-validity mask: padded rows of the last partial tile and fully out-of-range
    # (clamped) tiles contain garbage and must contribute exactly zero.
    tile_idx = p * tiles_per_slot + i
    row_ids = (jax.lax.broadcasted_iota(jnp.int32, (tile_rows, 1), 0)
               + tile_idx * tile_rows)
    valid = row_ids < n_rows                                # (tile_rows, 1) bool

    # ---- teacher softmax pieces (shared by both KL terms) -------------------
    t_max = jnp.max(ts, axis=1, keepdims=True)
    t_exp = jnp.exp(ts - t_max)
    t_sum = jnp.sum(t_exp, axis=1, keepdims=True)
    inv_tsum = pl.reciprocal(t_sum, approx=approx_recip)
    t_lse = t_max + jnp.log(t_sum)

    # ---- student softmax pieces (s_exp reused by the balanced shared-max path) ----
    s_max = jnp.max(ss, axis=1, keepdims=True)
    s_exp = jnp.exp(ss - s_max)
    s_sum = jnp.sum(s_exp, axis=1, keepdims=True)
    s_lse = s_max + jnp.log(s_sum)

    # KL_row = sum_j p_j*(ts_j - ss_j) + lse(ss) - lse(ts)   (since sum_j p_j = 1)
    diff = ts - ss
    dot = jnp.sum(t_exp * diff, axis=1, keepdims=True)
    row_kl = dot * inv_tsum + s_lse - t_lse                  # (tile_rows, 1)

    if compute_balanced:
        bp = b_ref[...]                                      # (2, C) f32
        b = bp[0:1, :]                                       # bias / T
        if shared_max:
            # bias <= 0  ->  exp(bias/T) <= 1, so the unbiased row maxes remain valid
            # stabilizers and no new exp / max passes are needed (review item 1).
            eb = bp[1:2, :]                                  # exp(bias / T)
            sb_sum = jnp.sum(s_exp * eb, axis=1, keepdims=True)
            sb_lse = s_max + jnp.log(sb_sum)
            if teacher_biased:
                # option == 'teacher_student': bias cancels inside (teacher - student).
                tb_exp = t_exp * eb
                tb_sum = jnp.sum(tb_exp, axis=1, keepdims=True)
                inv_tbsum = pl.reciprocal(tb_sum, approx=approx_recip)
                tb_lse = t_max + jnp.log(tb_sum)
                dot_b = jnp.sum(tb_exp * diff, axis=1, keepdims=True)
                row_kl_b = dot_b * inv_tbsum + sb_lse - tb_lse
            else:
                # option == 'student': teacher distribution unchanged -> reuse dot,
                # inv_tsum and t_lse; only one extra lane reduction.
                dot_bias = jnp.sum(t_exp * b, axis=1, keepdims=True)
                row_kl_b = (dot - dot_bias) * inv_tsum + sb_lse - t_lse
        else:
            # Fallback (gamma < 0 -> bias may be positive): biased-max path.
            ssb = ss + b
            sb_max = jnp.max(ssb, axis=1, keepdims=True)
            sb_lse = sb_max + jnp.log(jnp.sum(jnp.exp(ssb - sb_max), axis=1,
                                              keepdims=True))
            if teacher_biased:
                tsb = ts + b
                tb_max = jnp.max(tsb, axis=1, keepdims=True)
                tb_exp = jnp.exp(tsb - tb_max)
                tb_sum = jnp.sum(tb_exp, axis=1, keepdims=True)
                inv_tbsum = pl.reciprocal(tb_sum, approx=approx_recip)
                tb_lse = tb_max + jnp.log(tb_sum)
                dot_b = jnp.sum(tb_exp * diff, axis=1, keepdims=True)
                row_kl_b = dot_b * inv_tbsum + sb_lse - tb_lse
            else:
                dot_b = jnp.sum(t_exp * (diff - b), axis=1, keepdims=True)
                row_kl_b = dot_b * inv_tsum + sb_lse - t_lse
        vals = jnp.concatenate([row_kl, row_kl_b], axis=1)   # (tile_rows, 2)
    else:
        vals = row_kl                                        # (tile_rows, 1)

    # Per-row accumulation into the VMEM-resident output block; no per-step
    # vector->scalar reduce or SMEM store (review item 7).
    out_ref[...] += jnp.where(valid, vals, 0.0)


# ---------------------------------- wrapper -----------------------------------

def _kl_partial_sums(student, teacher, bias_pack, *, compute_balanced,
                     teacher_biased, shared_max, tile_rows=None,
                     num_parallel=None, approx_recip=True):
    """Returns a (n_terms,) vector of un-normalized pointwise-KL sums."""
    n, c = student.shape
    prof = _tpu_profile()
    itemsize = max(jnp.dtype(student.dtype).itemsize,
                   jnp.dtype(teacher.dtype).itemsize)
    tm = tile_rows if tile_rows is not None else _choose_tile_rows(
        n, c, itemsize, prof["tile_budget"])
    num_tiles = pl.cdiv(n, tm)
    npar = num_parallel if num_parallel is not None else prof["cores"]
    npar = max(1, min(npar, num_tiles))
    inner = pl.cdiv(num_tiles, npar)
    n_terms = 2 if compute_balanced else 1

    kernel = functools.partial(
        _kl_sums_kernel, n_rows=n, tile_rows=tm, tiles_per_slot=inner,
        inv_t=1.0 / T_KD, compute_balanced=compute_balanced,
        teacher_biased=teacher_biased, shared_max=shared_max,
        approx_recip=approx_recip)

    last_tile = num_tiles - 1

    def row_map(p, i):
        # Trailing out-of-range tiles (when num_tiles % npar != 0) are clamped to the
        # last real tile; the kernel masks all of their rows, so the duplicate read
        # is harmless (and elided by the pipeliner when the block index repeats).
        return (jnp.minimum(p * inner + i, last_tile), 0)

    in_specs = [pl.BlockSpec((tm, c), row_map),
                pl.BlockSpec((tm, c), row_map)]
    args = [student, teacher]
    if compute_balanced:
        in_specs.append(pl.BlockSpec((2, c), lambda p, i: (0, 0)))  # resident bias pack
        args.append(bias_pack)

    n_el = n * c
    exp_passes = 2
    if compute_balanced and not shared_max:
        exp_passes += 2 if teacher_biased else 1
    cost = pl.CostEstimate(
        flops=(12 if compute_balanced else 8) * n_el,
        transcendentals=exp_passes * n_el,
        bytes_accessed=int(student.size * student.dtype.itemsize
                           + teacher.size * teacher.dtype.itemsize
                           + (bias_pack.size * 4 if compute_balanced else 0)
                           + npar * tm * n_terms * 4))

    partials = pl.pallas_call(
        kernel,
        out_shape=jax.ShapeDtypeStruct((npar, tm, n_terms), jnp.float32),
        grid=(npar, inner),
        in_specs=in_specs,
        out_specs=pl.BlockSpec((None, tm, n_terms), lambda p, i: (p, 0, 0)),
        compiler_params=pltpu.CompilerParams(
            dimension_semantics=("parallel", "arbitrary"),
            vmem_limit_bytes=prof["vmem_limit"]),
        cost_estimate=cost,
    )(*args)

    # Tiny per-row / per-core partials: final tree reduction in plain XLA.
    return jnp.sum(partials, axis=(0, 1))                    # (n_terms,)


def single_factor_forward(W, logits, teacher_logits, cls_num_list=None,
                          option="student", gamma=1.0, tile_rows=None,
                          num_parallel=None, approx_recip=True):
    """JAX/Pallas equivalent of single_factor.forward."""
    n, c = logits.shape
    compute_balanced = cls_num_list is not None
    teacher_biased = compute_balanced and option == "teacher_student"
    # bias = log(normalized_freq + eps) * gamma <= 0 whenever gamma >= 0, which lets the
    # kernel reuse the unbiased row maxes / exp tiles for the biased logsumexps.
    shared_max = compute_balanced and (gamma >= 0)

    if compute_balanced:
        cw = jnp.asarray(cls_num_list, jnp.float32).reshape(1, c)
        cw = cw / jnp.sum(cw)
        bias_t = jnp.log(cw + _EPS) * (gamma / T_KD)          # bias / T, (1, C)
        bias_pack = jnp.concatenate([bias_t, jnp.exp(bias_t)], axis=0)  # (2, C)
    else:
        bias_pack = None

    sums = _kl_partial_sums(logits, teacher_logits, bias_pack,
                            compute_balanced=compute_balanced,
                            teacher_biased=teacher_biased,
                            shared_max=shared_max,
                            tile_rows=tile_rows, num_parallel=num_parallel,
                            approx_recip=approx_recip)

    inv_ne = 1.0 / (n * c)                                    # KLDivLoss reduction='mean'
    loss = sums[0] * inv_ne
    # Fast path (module default cls_num_list=None): balanced_loss == loss, the second KL
    # is never computed and the sigmoid mix is exact.
    balanced = sums[1] * inv_ne if compute_balanced else loss

    factor = jax.nn.sigmoid(jnp.asarray(W, jnp.float32))
    return (1.0 - factor) * loss + factor * balanced


# ----------------------------- pure-JAX reference -----------------------------

def _kd_kl_loss_ref(o_student, o_teacher, T=T_KD, w=1.0, gamma=1.0,
                    cls_num_list=None, option="teacher_student"):
    s = o_student.astype(jnp.float32)
    t = o_teacher.astype(jnp.float32)
    if cls_num_list is not None:
        cw = jnp.asarray(cls_num_list, jnp.float32).reshape(1, -1)
        weight = cw / jnp.sum(cw)
        s = s + jnp.log(weight + _EPS) * gamma
        if option == "teacher_student":
            t = t + jnp.log(weight + _EPS) * gamma
    log_q = jax.nn.log_softmax(s / T, axis=1)
    p = jax.nn.softmax(t / T, axis=1)
    log_p = jax.nn.log_softmax(t / T, axis=1)
    return jnp.mean(p * (log_p - log_q)) * w                  # KLDivLoss reduction='mean'


def _single_factor_ref(W, logits, teacher_logits, cls_num_list=None,
                       option="student", gamma=1.0):
    factor = jax.nn.sigmoid(jnp.asarray(W, jnp.float32))
    loss = _kd_kl_loss_ref(logits, teacher_logits)
    balanced = _kd_kl_loss_ref(logits, teacher_logits, cls_num_list=cls_num_list,
                               option=option, gamma=gamma)
    return (1.0 - factor) * loss + factor * balanced


if __name__ == "__main__":
    key = jax.random.PRNGKey(0)
    k1, k2, k3, k4 = jax.random.split(key, 4)

    N, C = 8, 32
    logits = jax.random.normal(k1, (N, C), dtype=jnp.float32)
    teacher = jax.random.normal(k2, (N, C), dtype=jnp.float32)
    cls_num_list = [float(v) for v in np.linspace(100.0, 4.0, C)]

    # 1) module default path: cls_num_list=None (single-KL fast path), exact reciprocal
    out1 = jax.block_until_ready(single_factor_forward(0.0, logits, teacher,
                                                       approx_recip=False))
    ref1 = _single_factor_ref(0.0, logits, teacher)
    np.testing.assert_allclose(np.asarray(out1), np.asarray(ref1), rtol=1e-5, atol=1e-7)

    # 2) balanced path, option='student' (shared-max rewrite, no extra exp/max pass)
    out2 = jax.block_until_ready(single_factor_forward(
        0.3, logits, teacher, cls_num_list=cls_num_list, option="student",
        approx_recip=False))
    ref2 = _single_factor_ref(0.3, logits, teacher, cls_num_list=cls_num_list,
                              option="student")
    np.testing.assert_allclose(np.asarray(out2), np.asarray(ref2), rtol=1e-5, atol=1e-7)

    # 3) balanced path, option='teacher_student' (shared-max, shared teacher exp tile)
    out3 = jax.block_until_ready(single_factor_forward(
        -0.7, logits, teacher, cls_num_list=cls_num_list,
        option="teacher_student", approx_recip=False))
    ref3 = _single_factor_ref(-0.7, logits, teacher, cls_num_list=cls_num_list,
                              option="teacher_student")
    np.testing.assert_allclose(np.asarray(out3), np.asarray(ref3), rtol=1e-5, atol=1e-7)

    # 4) multi-tile grid, partial (masked) last tile, 2 parallel slots, approx reciprocal
    N2 = 20
    s4 = jax.random.normal(k3, (N2, C), dtype=jnp.float32)
    t4 = jax.random.normal(k4, (N2, C), dtype=jnp.float32)
    out4 = jax.block_until_ready(single_factor_forward(
        0.1, s4, t4, cls_num_list=cls_num_list, option="student",
        tile_rows=8, num_parallel=2))
    ref4 = _single_factor_ref(0.1, s4, t4, cls_num_list=cls_num_list, option="student")
    np.testing.assert_allclose(np.asarray(out4), np.asarray(ref4), rtol=5e-3, atol=1e-5)

    # 5) bf16 inputs stay bf16 in HBM, upcast inside the kernel
    s5 = logits.astype(jnp.bfloat16)
    t5 = teacher.astype(jnp.bfloat16)
    out5 = jax.block_until_ready(single_factor_forward(0.0, s5, t5))
    ref5 = _single_factor_ref(0.0, s5.astype(jnp.float32), t5.astype(jnp.float32))
    np.testing.assert_allclose(np.asarray(out5), np.asarray(ref5), rtol=5e-3, atol=1e-5)

    # 6) gamma < 0 exercises the biased-max fallback path
    out6 = jax.block_until_ready(single_factor_forward(
        0.2, logits, teacher, cls_num_list=cls_num_list,
        option="teacher_student", gamma=-0.5, approx_recip=False))
    ref6 = _single_factor_ref(0.2, logits, teacher, cls_num_list=cls_num_list,
                              option="teacher_student", gamma=-0.5)
    np.testing.assert_allclose(np.asarray(out6), np.asarray(ref6), rtol=1e-5, atol=1e-7)

    print("KERNEL_OK")
</pallas_src>

<mosaic_0001>
module attributes {stable_mosaic.version = 11 : i64} {
  func.func @_kl_sums_kernel(%arg0: i32, %arg1: i32, %arg2: memref<8x32xf32, #tpu.memory_space<vmem>>, %arg3: memref<8x32xf32, #tpu.memory_space<vmem>>, %arg4: memref<1x8x1xf32, #tpu.memory_space<vmem>>) attributes {dimension_semantics = [#tpu.dimension_semantics<parallel>, #tpu.dimension_semantics<arbitrary>], iteration_bounds = array<i64: 1, 1>, scalar_prefetch = 0 : i64, scratch_operands = 0 : i64, tpu.core_type = #tpu.core_type<tc>, window_params = [{transform_indices = @transform_0, window_bounds = array<i64: 8, 32>}, {transform_indices = @transform_1, window_bounds = array<i64: 8, 32>}, {transform_indices = @transform_2, window_bounds = array<i64: 1, 8, 1>}]} {
    %c0_i32 = arith.constant 0 : i32
    %0 = arith.cmpi eq, %arg1, %c0_i32 : i32
    %1 = arith.extui %0 : i1 to i32
    %c0_i32_0 = arith.constant 0 : i32
    %2 = arith.cmpi ne, %1, %c0_i32_0 : i32
    scf.if %2 {
      %cst_18 = arith.constant 0.000000e+00 : f32
      %51 = vector.broadcast %cst_18 : f32 to vector<8x1xf32>
      %c0_19 = arith.constant 0 : index
      %c0_20 = arith.constant 0 : index
      %c0_21 = arith.constant 0 : index
      %52 = vector.load %arg4[%c0_19, %c0_20, %c0_21] : memref<1x8x1xf32, #tpu.memory_space<vmem>>, vector<1x8x1xf32>
      %53 = vector.shape_cast %52 : vector<1x8x1xf32> to vector<8x1xf32>
      %54 = vector.shape_cast %51 : vector<8x1xf32> to vector<1x8x1xf32>
      tpu.vector_store %arg4[%c0_19, %c0_20, %c0_21], %54 {strides = array<i32>} : memref<1x8x1xf32, #tpu.memory_space<vmem>>, vector<1x8x1xf32>,
    } else {
    }
    %c0 = arith.constant 0 : index
    %c0_1 = arith.constant 0 : index
    %3 = vector.load %arg2[%c0, %c0_1] : memref<8x32xf32, #tpu.memory_space<vmem>>, vector<8x32xf32>
    %cst = arith.constant 5.000000e-01 : f32
    %4 = vector.broadcast %cst : f32 to vector<8x32xf32>
    %5 = arith.mulf %3, %4 : vector<8x32xf32>
    %c0_2 = arith.constant 0 : index
    %c0_3 = arith.constant 0 : index
    %6 = vector.load %arg3[%c0_2, %c0_3] : memref<8x32xf32, #tpu.memory_space<vmem>>, vector<8x32xf32>
    %cst_4 = arith.constant 5.000000e-01 : f32
    %7 = vector.broadcast %cst_4 : f32 to vector<8x32xf32>
    %8 = arith.mulf %6, %7 : vector<8x32xf32>
    %c1_i32 = arith.constant 1 : i32
    %9 = arith.muli %arg0, %c1_i32 : i32
    %10 = arith.addi %9, %arg1 : i32
    %11 = tpu.iota {dimensions = array<i32: 0>} : vector<8x1xi32>
    %c8_i32 = arith.constant 8 : i32
    %12 = arith.muli %10, %c8_i32 : i32
    %13 = vector.broadcast %12 : i32 to vector<8x1xi32>
    %14 = arith.addi %11, %13 : vector<8x1xi32>
    %c8_i32_5 = arith.constant 8 : i32
    %15 = vector.broadcast %c8_i32_5 : i32 to vector<8x1xi32>
    %16 = arith.cmpi slt, %14, %15 : vector<8x1xi32>
    %cst_6 = arith.constant dense<0xFF800000> : vector<8xf32>
    %17 = vector.multi_reduction <maximumf>, %8, %cst_6 [1] : vector<8x32xf32> to vector<8xf32>
    %18 = vector.shape_cast %17 : vector<8xf32> to vector<8x1xf32>
    %19 = vector.broadcast %18 : vector<8x1xf32> to vector<8x32xf32>
    %20 = arith.subf %8, %19 : vector<8x32xf32>
    %21 = math.exp %20 : vector<8x32xf32>
    %cst_7 = arith.constant dense<0.000000e+00> : vector<8xf32>
    %22 = vector.multi_reduction <add>, %21, %cst_7 [1] : vector<8x32xf32> to vector<8xf32>
    %23 = vector.shape_cast %22 : vector<8xf32> to vector<8x1xf32>
    %24 = tpu.reciprocal %23 : vector<8x1xf32> -> vector<8x1xf32>
    %25 = math.log %23 : vector<8x1xf32>
    %26 = arith.addf %18, %25 : vector<8x1xf32>
    %cst_8 = arith.constant dense<0xFF800000> : vector<8xf32>
    %27 = vector.multi_reduction <maximumf>, %5, %cst_8 [1] : vector<8x32xf32> to vector<8xf32>
    %28 = vector.shape_cast %27 : vector<8xf32> to vector<8x1xf32>
    %29 = vector.broadcast %28 : vector<8x1xf32> to vector<8x32xf32>
    %30 = arith.subf %5, %29 : vector<8x32xf32>
    %31 = math.exp %30 : vector<8x32xf32>
    %cst_9 = arith.constant dense<0.000000e+00> : vector<8xf32>
    %32 = vector.multi_reduction <add>, %31, %cst_9 [1] : vector<8x32xf32> to vector<8xf32>
    %33 = vector.shape_cast %32 : vector<8xf32> to vector<8x1xf32>
    %34 = math.log %33 : vector<8x1xf32>
    %35 = arith.addf %28, %34 : vector<8x1xf32>
    %36 = arith.subf %8, %5 : vector<8x32xf32>
    %37 = arith.mulf %21, %36 : vector<8x32xf32>
    %cst_10 = arith.constant dense<0.000000e+00> : vector<8xf32>
    %38 = vector.multi_reduction <add>, %37, %cst_10 [1] : vector<8x32xf32> to vector<8xf32>
    %39 = vector.shape_cast %38 : vector<8xf32> to vector<8x1xf32>
    %40 = arith.mulf %39, %24 : vector<8x1xf32>
    %41 = arith.addf %40, %35 : vector<8x1xf32>
    %42 = arith.subf %41, %26 : vector<8x1xf32>
    %c0_11 = arith.constant 0 : index
    %c0_12 = arith.constant 0 : index
    %c0_13 = arith.constant 0 : index
    %43 = vector.load %arg4[%c0_11, %c0_12, %c0_13] : memref<1x8x1xf32, #tpu.memory_space<vmem>>, vector<1x8x1xf32>
    %44 = vector.shape_cast %43 : vector<1x8x1xf32> to vector<8x1xf32>
    %cst_14 = arith.constant 0.000000e+00 : f32
    %45 = vector.broadcast %cst_14 : f32 to vector<8x1xf32>
    %46 = arith.select %16, %42, %45 : vector<8x1xi1>, vector<8x1xf32>
    %47 = arith.addf %44, %46 : vector<8x1xf32>
    %c0_15 = arith.constant 0 : index
    %c0_16 = arith.constant 0 : index
    %c0_17 = arith.constant 0 : index
    %48 = vector.load %arg4[%c0_15, %c0_16, %c0_17] : memref<1x8x1xf32, #tpu.memory_space<vmem>>, vector<1x8x1xf32>
    %49 = vector.shape_cast %48 : vector<1x8x1xf32> to vector<8x1xf32>
    %50 = vector.shape_cast %47 : vector<8x1xf32> to vector<1x8x1xf32>
    tpu.vector_store %arg4[%c0_15, %c0_16, %c0_17], %50 {strides = array<i32>} : memref<1x8x1xf32, #tpu.memory_space<vmem>>, vector<1x8x1xf32>,
    return
  }
  func.func @transform_0(%arg0: i32, %arg1: i32) -> (i32, i32) {
    %c1_i32 = arith.constant 1 : i32
    %0 = arith.muli %arg0, %c1_i32 : i32
    %1 = arith.addi %0, %arg1 : i32
    %c0_i32 = arith.constant 0 : i32
    %2 = arith.minsi %1, %c0_i32 : i32
    %c0_i32_0 = arith.constant 0 : i32
    %c0_i32_1 = arith.constant 0 : i32
    return %2, %c0_i32_0 : i32, i32
  }
  func.func @transform_1(%arg0: i32, %arg1: i32) -> (i32, i32) {
    %c1_i32 = arith.constant 1 : i32
    %0 = arith.muli %arg0, %c1_i32 : i32
    %1 = arith.addi %0, %arg1 : i32
    %c0_i32 = arith.constant 0 : i32
    %2 = arith.minsi %1, %c0_i32 : i32
    %c0_i32_0 = arith.constant 0 : i32
    %c0_i32_1 = arith.constant 0 : i32
    return %2, %c0_i32_0 : i32, i32
  }
  func.func @transform_2(%arg0: i32, %arg1: i32) -> (i32, i32, i32) {
    %c0_i32 = arith.constant 0 : i32
    %c0_i32_0 = arith.constant 0 : i32
    %c0_i32_1 = arith.constant 0 : i32
    return %arg0, %c0_i32, %c0_i32_0 : i32, i32, i32
  }
}

</mosaic_0001>

<bundles_post_ra>
// kernel: tpu_custom_call.1
= control target key start
LH: loop header
LB: loop body
LE: loop exit
PB: predicated region body
PF: predicated region fallthrough
CT: control target
= control target key end

     0   :  { %7 = vsyncpa [#allocation3], 0  ;;  %s239_s0 = inlined_call_operand.hbm [shape: f32[8,32], index: 0, kind: input, shape index: {}]   ;;  %s240_s1 = inlined_call_operand.hbm [shape: f32[8,32], index: 1, kind: input, shape index: {}]   ;;  %s241_s2 = inlined_call_operand.vmem [shape: f32[1,8,1], index: 2, kind: output, shape index: {}]  }
   0x1   :  { %s19_s11 = sshll.u32 %s239_s0, 4  ;;  %s20_s11 = int_to_ptr.hbm [resolvable:$true] %s19_s11 }
   0x2   :  { %8 = vsyncpa [#allocation5], 0  ;;  %s199_s12 = smov [#allocation2]   ;;  %s35_s16 = sshll.u32 %s240_s1, 4  ;;  %s36_s16 = int_to_ptr.hbm [resolvable:$true] %s35_s16 }
   0x3   :  { %s21_s13 = sshll.u32 %s199_s12, 4  ;;  %s200_s17 = smov [#allocation4]   ;;  %s22_s13 = int_to_ptr.vmem [resolvable:$true] %s21_s13 }
   0x4   :  { %24 = dma.hbm_to_vmem [thread:$0]  %s20_s11, 128, %s22_s13, [#allocation3]  }
   0x5   :  { %s37_s18 = sshll.u32 %s200_s17, 4  ;;  %s38_s18 = int_to_ptr.vmem [resolvable:$true] %s37_s18 }
   0x6   :  { %40 = dma.hbm_to_vmem [thread:$0]  %s36_s16, 128, %s38_s18, [#allocation5]  }
   0x7   :  { %195 = dma.done.wait [#allocation3], 128  }
   0x8   :  { %196 = vsyncadd [#allocation3], 4294967168 }
   0x9   :  { %197 = dma.done.wait [#allocation5], 128  }
   0xa   :  { %198 = vsyncadd [#allocation5], 4294967168  ;;  %vm59_vm0 = vcmask 7168   ;;  %v201_v0 = vmov 0.0   ;;  %v63_v1 = vld [vmem:[#allocation4] sm:$0xff]  ;;  %vm72_vm1 = vcmask 261120  }
   0xb   :  { %60 = vst.msk [vmem:[%s241_s2] sm:$0xff] %vm59_vm0, %v201_v0  ;;  %v64_v2 = vmul.f32 0.5, %v63_v1  ;;  %v61_v3 = vld [vmem:[#allocation2] sm:$0xff] }
   0xc   :  { %v62_v5 = vmul.f32 0.5, %v61_v3 }
   0xd   :  { %v73_v4 = vsel %vm72_vm1, %v64_v2, -inf }
   0xe   :  { %74 = vmax.xlane.f32.xlu0 %v73_v4  ;;  %v99_v6 = vsel %vm72_vm1, %v62_v5, -inf  ;;  %v111_v11 = vsub.f32 %v64_v2, %v62_v5 }
  0x12   :  { %v119_v41 = vld [vmem:[%s241_s2] sm:$0xff] }
  0x16   :  { %100 = vmax.xlane.f32.xlu0 %v99_v6 }
  0x81   :  { %v75_v7 = vpop.xlane.xlu0 %74 }
  0x82   :  { %v76_v8 = vsub.f32 %v64_v2, %v75_v7 }
  0x84   :  { %v77_v9 = vmul.f32 1.442695, %v76_v8 }
  0x86   :  { %137 = vpow2.f32 %v77_v9 }
  0x89   :  { %v101_v10 = vpop.xlane.xlu0 %100 }
  0x8a   :  { %v102_v12 = vsub.f32 %v62_v5, %v101_v10 }
  0x8c   :  { %v138_v13 = vpop.eup %137  ;;  %v103_v14 = vmul.f32 1.442695, %v102_v12 }
  0x8d   :  { %v79_v15 = vsel %vm72_vm1, %v138_v13, 0.0  ;;  %v112_v16 = vmul.f32 %v138_v13, %v111_v11 }
  0x8e   :  { %139 = vpow2.f32 %v103_v14  ;;  %80 = vadd.xlane.f32.xlu1 %v79_v15 }
  0x8f   :  { %v113_v17 = vsel %vm72_vm1, %v112_v16, 0.0 }
  0x90   :  { %114 = vadd.xlane.f32.xlu2 %v113_v17 }
  0x94   :  { %v140_v18 = vpop.eup %139 }
  0x95   :  { %v105_v19 = vsel %vm72_vm1, %v140_v18, 0.0 }
  0x96   :  { %106 = vadd.xlane.f32.xlu1 %v105_v19 }
 0x101   :  { %v81_v20 = vpop.xlane.xlu1 %80 }
 0x102   :  { %141 = vrcp.f32 %v81_v20  ;;  %v93_v25 = vand.u32 2147483648, %v81_v20  ;;  %v91_v27 = vand.u32 2147483647, %v81_v20  ;;  %vm87_vm3 = vweird.f32 %v81_v20 }
 0x103   :  { %143 = vlog2.f32 %v81_v20  ;;  %v115_v36 = vpop.xlane.xlu2 %114 }
 0x104   :  { %v94_v31 = vor.u32 1.1754944e-38, %v93_v25  ;;  %vm92_vm5 = vcmp.eq.f32.partialorder %v91_v27, 8.507059e+37 }
 0x108   :  { %v142_v21 = vpop.eup %141 }
 0x109   :  { %v83_v22 = vmul.f32 %v142_v21, %v81_v20  ;;  %v107_v23 = vpop.xlane.xlu1 %106  ;;  %vm88_vm2 = vweird.f32 %v142_v21  ;;  %v144_v28 = vpop.eup %143 }
 0x10a   :  { %145 = vlog2.f32 %v107_v23  ;;  %vm89_vm4 = vmor %vm87_vm3, %vm88_vm2  ;;  %v97_v33 = vmul.f32 0.6931472, %v144_v28 }
 0x10b   :  { %v84_v24 = vsub.f32 1.0, %v83_v22 }
 0x10c   :  { %v98_v39 = vadd.f32 %v97_v33, %v75_v7 }
 0x10d   :  { %v85_v26 = vmul.f32 %v142_v21, %v84_v24 }
 0x10f   :  { %v86_v29 = vadd.f32 %v142_v21, %v85_v26 }
 0x110   :  { %v146_v30 = vpop.eup %145 }
 0x111   :  { %v90_v32 = vsel %vm89_vm4, %v142_v21, %v86_v29  ;;  %v109_v34 = vmul.f32 0.6931472, %v146_v30 }
 0x112   :  { %v95_v35 = vsel %vm92_vm5, %v94_v31, %v90_v32 }
 0x113   :  { %v116_v37 = vmul.f32 %v115_v36, %v95_v35  ;;  %v110_v38 = vadd.f32 %v109_v34, %v101_v10 }
 0x115   :  { %v117_v40 = vadd.f32 %v116_v37, %v110_v38 }
 0x117   :  { %v118_v42 = vsub.f32 %v117_v40, %v98_v39 }
 0x119   :  { %v121_v43 = vadd.f32 %v119_v41, %v118_v42 }
 0x11b   :  { %123 = vst.msk [vmem:[%s241_s2] sm:$0xff] %vm59_vm0, %v121_v43 }
 0x11c   :  { %128 = vsyncpa [#allocation3], 1 }
 0x11d   :  { %129 = vsyncpa [#allocation5], 1 }

</bundles_post_ra>
